<compile_context>
chip_gen: v7x
topology: tpu7x:2x2x1
jax: 0.10.0
libtpu: 0.0.40
codegen_flags: <defaults>
</compile_context>

<pallas_src>
import functools

import jax
import jax.numpy as jnp
from jax import lax
from jax.experimental import pallas as pl
from jax.experimental.pallas import tpu as pltpu

_EPS = 1e-5  # PyTorch InstanceNorm default


# --------------------------------------------------------------------------- #
# Kernels
# --------------------------------------------------------------------------- #
def _adain_flat_kernel(x_ref, ss_ref, o_ref):
    """One-pass-over-HBM AdaIn: block = (TB, TC, S) with the full spatial row."""
    xf = x_ref[...].astype(jnp.float32)                  # (TB, TC, S)
    # Two-pass statistics over the VMEM-resident tile (numerically safer than
    # E[x^2] - mu^2); biased variance, like PyTorch InstanceNorm.
    mu = jnp.mean(xf, axis=-1, keepdims=True)            # (TB, TC, 1)
    d = xf - mu
    var = jnp.mean(d * d, axis=-1, keepdims=True)
    rstd = lax.rsqrt(var + _EPS)

    ss = ss_ref[...]                                     # (TB, TC, 2) f32
    scale = ss[:, :, 0:1] * rstd                         # softplus(h_var)*gamma*rstd
    shift = ss[:, :, 1:2]                                # softplus(h_var)*beta + h_mean

    # out = (x - mu) * rstd * (z_var*gamma) + (z_var*beta + z_mean), all in f32.
    o_ref[...] = (d * scale + shift).astype(o_ref.dtype)


def _adain_tiled_kernel(x_ref, ss_ref, o_ref, s1_ref, s2_ref, *,
                        s_true, ts, needs_mask):
    """Large-spatial fallback: grid = (N-tiles, C-tiles, phase=2, S-tiles).

    Phase 0 accumulates per-(n,c) sum / sum-of-squares over all spatial tiles
    into VMEM scratch; phase 1 folds InstanceNorm+AdaIn into one scale/shift
    (at its first spatial step) and applies it tile by tile.
    """
    p = pl.program_id(2)
    s = pl.program_id(3)
    xf = x_ref[...].astype(jnp.float32)                  # (TB, TC, TS)

    @pl.when(jnp.logical_and(p == 0, s == 0))
    def _():
        s1_ref[...] = jnp.zeros_like(s1_ref)
        s2_ref[...] = jnp.zeros_like(s2_ref)

    @pl.when(p == 0)
    def _():
        xm = xf
        if needs_mask:  # mask the out-of-bounds tail of the last spatial tile
            col = lax.broadcasted_iota(jnp.int32, xf.shape, 2)
            xm = jnp.where(s * ts + col < s_true, xf, 0.0)
        s1_ref[...] += jnp.sum(xm, axis=-1, keepdims=True)
        s2_ref[...] += jnp.sum(xm * xm, axis=-1, keepdims=True)

    @pl.when(jnp.logical_and(p == 1, s == 0))
    def _():
        # One-pass variance (clamped); f32 accumulators keep this accurate for
        # the huge-spatial sizes that reach this fallback path.
        inv_n = jnp.float32(1.0 / s_true)
        mu = s1_ref[...] * inv_n
        var = jnp.maximum(s2_ref[...] * inv_n - mu * mu, 0.0)
        rstd = lax.rsqrt(var + _EPS)
        ss = ss_ref[...]                                  # (TB, TC, 2)
        scale = ss[:, :, 0:1] * rstd
        shift = ss[:, :, 1:2] - mu * scale
        s1_ref[...] = scale                               # reuse scratch as scale
        s2_ref[...] = shift                               # reuse scratch as shift

    @pl.when(p == 1)
    def _():
        o_ref[...] = (xf * s1_ref[...] + s2_ref[...]).astype(o_ref.dtype)


# --------------------------------------------------------------------------- #
# Sizing helpers
# --------------------------------------------------------------------------- #
def _vmem_budget_bytes():
    """Generation-aware scoped-VMEM limit: ~3/4 of physical per-core VMEM."""
    try:
        phys = int(pltpu.get_tpu_info().vmem_capacity_bytes)
    except Exception:
        phys = 64 << 20  # conservative (v7x-sized) fallback
    return max(32 << 20, (phys * 3) // 4)   # 48 MiB on v7x, 96 MiB on v5e/v6e


def _sublane_multiple(itemsize):
    """Channel-tile rounding unit: 8 for f32, 16 for bf16, 32 for 8-bit types."""
    return 8 * max(1, 4 // max(1, int(itemsize)))


def _plan(N, C, S, itemsize, block_cap, target):
    """Return ('flat', TB, TC, S) or ('tiled', TB, TC, TS)."""
    sub = _sublane_multiple(itemsize)
    row_bytes = S * itemsize
    tc_min = C if C <= sub else sub

    if tc_min * row_bytes <= block_cap:
        # ---- Path A: full spatial row per block, single pass over HBM ----
        if C * row_bytes <= target:
            tc = C
            tb = int(max(1, min(N, target // (C * row_bytes))))
        else:
            tb = 1
            if C <= sub:
                tc = C
            else:
                per = max(sub, ((target // row_bytes) // sub) * sub)
                tc = int(min((C // sub) * sub, per))
        # Megacore: avoid a single-block grid so both v7x TensorCores get work.
        if tb >= N and tc >= C and (N > 1 or C >= 2 * sub):
            if N > 1:
                tb = (N + 1) // 2
            else:
                tc = max(sub, (((C + 1) // 2) // sub) * sub)
        return "flat", tb, tc, S

    # ---- Path B: spatial tiling (two-phase kernel), bounded VMEM for any S ----
    tb, tc = 1, tc_min
    max_ts = max(1, block_cap // (tc * itemsize))
    if max_ts >= S:
        ts = S
    else:
        ts = max(128, (max_ts // 128) * 128)
        if ts >= S:
            ts = S
    return "tiled", tb, tc, ts


# --------------------------------------------------------------------------- #
# Wrapper
# --------------------------------------------------------------------------- #
def adain(x, z, w, b, gamma, beta, *, block_cap_bytes=None):
    """x: (N, C, *spatial);  z: (N, Z);  w: (2C, Z);  b: (2C,);  gamma/beta: (C,)."""
    N, C = int(x.shape[0]), int(x.shape[1])
    spatial = x.shape[2:]
    S = 1
    for dim in spatial:
        S *= int(dim)

    # ---- AdaIn MLP + affine folding: one hoisted XLA GEMM over all samples ----
    h = z.astype(jnp.float32) @ w.astype(jnp.float32).T + b.astype(jnp.float32)
    z_mean = h[:, :C]
    z_var = jax.nn.softplus(h[:, C:])
    g = gamma.astype(jnp.float32)[None, :]
    be = beta.astype(jnp.float32)[None, :]
    ss = jnp.stack([z_var * g, z_var * be + z_mean], axis=-1)   # (N, C, 2) f32

    x3 = x.reshape(N, C, S)
    itemsize = jnp.dtype(x.dtype).itemsize

    budget = _vmem_budget_bytes()
    block_cap = int(block_cap_bytes) if block_cap_bytes is not None \
        else max(budget // 10, 1 << 20)
    target = min(8 << 20, block_cap)
    mode, TB, TC, TS = _plan(N, C, S, itemsize, block_cap, target)

    if mode == "flat":
        out = pl.pallas_call(
            _adain_flat_kernel,
            out_shape=jax.ShapeDtypeStruct((N, C, S), x.dtype),
            grid_spec=pltpu.PrefetchScalarGridSpec(
                num_scalar_prefetch=0,
                grid=(pl.cdiv(N, TB), pl.cdiv(C, TC)),
                in_specs=[
                    pl.BlockSpec((TB, TC, S), lambda i, j: (i, j, 0)),   # x
                    pl.BlockSpec((TB, TC, 2), lambda i, j: (i, j, 0)),   # scale/shift
                ],
                out_specs=pl.BlockSpec((TB, TC, S), lambda i, j: (i, j, 0)),
            ),
            compiler_params=pltpu.CompilerParams(
                dimension_semantics=("parallel", "parallel"),
                vmem_limit_bytes=int(budget)),
        )(x3, ss)
    else:
        kernel = functools.partial(
            _adain_tiled_kernel, s_true=S, ts=TS, needs_mask=(S % TS) != 0)
        out = pl.pallas_call(
            kernel,
            out_shape=jax.ShapeDtypeStruct((N, C, S), x.dtype),
            grid_spec=pltpu.PrefetchScalarGridSpec(
                num_scalar_prefetch=0,
                grid=(pl.cdiv(N, TB), pl.cdiv(C, TC), 2, pl.cdiv(S, TS)),
                in_specs=[
                    pl.BlockSpec((TB, TC, TS), lambda n, c, p, s: (n, c, s)),
                    pl.BlockSpec((TB, TC, 2), lambda n, c, p, s: (n, c, 0)),
                ],
                # During phase 0 the output block index stays pinned at (n,c,0),
                # so nothing is written back until phase 1 has filled it.
                out_specs=pl.BlockSpec((TB, TC, TS),
                                       lambda n, c, p, s: (n, c, p * s)),
                scratch_shapes=[pltpu.VMEM((TB, TC, 1), jnp.float32),
                                pltpu.VMEM((TB, TC, 1), jnp.float32)],
            ),
            compiler_params=pltpu.CompilerParams(
                dimension_semantics=("parallel", "parallel",
                                     "arbitrary", "arbitrary"),
                vmem_limit_bytes=int(budget)),
        )(x3, ss)

    return out.reshape(x.shape)


# --------------------------------------------------------------------------- #
# Pure-JAX reference (mirrors the PyTorch module)
# --------------------------------------------------------------------------- #
def adain_ref(x, z, w, b, gamma, beta):
    N, C = x.shape[0], x.shape[1]
    bcast = (N, C) + (1,) * (x.ndim - 2)
    h = z @ w.T + b                                     # (N, 2C)
    z_mean = h[:, :C].reshape(bcast)
    z_var = jax.nn.softplus(h[:, C:]).reshape(bcast)
    axes = tuple(range(2, x.ndim))
    mu = jnp.mean(x, axis=axes, keepdims=True)
    var = jnp.var(x, axis=axes, keepdims=True)          # biased, like PyTorch IN
    x_n = (x - mu) / jnp.sqrt(var + _EPS)
    x_n = x_n * gamma.reshape((1, C) + (1,) * (x.ndim - 2)) \
              + beta.reshape((1, C) + (1,) * (x.ndim - 2))
    return x_n * z_var + z_mean


if __name__ == "__main__":
    N, C, H, W_, Z = 2, 4, 16, 16, 32

    key = jax.random.PRNGKey(0)
    kx, kz, kw, kb, kg, kbe = jax.random.split(key, 6)

    x = jax.random.normal(kx, (N, C, H, W_), dtype=jnp.float32)
    z = jax.random.normal(kz, (N, Z), dtype=jnp.float32)
    w = 0.1 * jax.random.normal(kw, (2 * C, Z), dtype=jnp.float32)
    b = 0.1 * jax.random.normal(kb, (2 * C,), dtype=jnp.float32)
    gamma = 1.0 + 0.1 * jax.random.normal(kg, (C,), dtype=jnp.float32)
    beta = 0.1 * jax.random.normal(kbe, (C,), dtype=jnp.float32)

    out = jax.block_until_ready(adain(x, z, w, b, gamma, beta))
    ref = adain_ref(x, z, w, b, gamma, beta)
    assert out.shape == x.shape
    assert jnp.allclose(out, ref, atol=1e-4, rtol=1e-4), "mismatch vs reference (4D)"

    # 5-D (InstanceNorm3d) branch uses the same kernel via spatial flattening.
    x5 = jax.random.normal(kx, (N, C, 4, 8, 8), dtype=jnp.float32)
    out5 = jax.block_until_ready(adain(x5, z, w, b, gamma, beta))
    ref5 = adain_ref(x5, z, w, b, gamma, beta)
    assert jnp.allclose(out5, ref5, atol=1e-4, rtol=1e-4), "mismatch vs reference (5D)"

    # Non-128-multiple spatial size: full-extent last dim, no pad/slice round trip.
    xs = jax.random.normal(kx, (N, C, 10, 10), dtype=jnp.float32)
    outs = jax.block_until_ready(adain(xs, z, w, b, gamma, beta))
    refs = adain_ref(xs, z, w, b, gamma, beta)
    assert jnp.allclose(outs, refs, atol=1e-4, rtol=1e-4), "mismatch vs reference (non-128 S)"

    # Force the large-spatial fallback (two-phase spatial-tiled kernel with a
    # masked tail tile) by shrinking the block budget.
    xb = jax.random.normal(kx, (N, C, 20, 15), dtype=jnp.float32)
    outb = jax.block_until_ready(adain(xb, z, w, b, gamma, beta, block_cap_bytes=2048))
    refb = adain_ref(xb, z, w, b, gamma, beta)
    assert jnp.allclose(outb, refb, atol=1e-4, rtol=1e-4), "mismatch vs reference (tiled S)"

    print("KERNEL_OK")
</pallas_src>

<mosaic_0001>
module attributes {stable_mosaic.version = 11 : i64} {
  func.func @_adain_flat_kernel(%arg0: i32, %arg1: i32, %arg2: memref<1x4x256xf32, #tpu.memory_space<vmem>>, %arg3: memref<1x4x2xf32, #tpu.memory_space<vmem>>, %arg4: memref<1x4x256xf32, #tpu.memory_space<vmem>>) attributes {dimension_semantics = [#tpu.dimension_semantics<parallel>, #tpu.dimension_semantics<parallel>], iteration_bounds = array<i64: 2, 1>, scalar_prefetch = 0 : i64, scratch_operands = 0 : i64, tpu.core_type = #tpu.core_type<tc>, window_params = [{transform_indices = @transform_0, window_bounds = array<i64: 1, 4, 256>}, {transform_indices = @transform_1, window_bounds = array<i64: 1, 4, 2>}, {transform_indices = @transform_2, window_bounds = array<i64: 1, 4, 256>}]} {
    %c0 = arith.constant 0 : index
    %c0_0 = arith.constant 0 : index
    %c0_1 = arith.constant 0 : index
    %0 = vector.load %arg2[%c0, %c0_0, %c0_1] : memref<1x4x256xf32, #tpu.memory_space<vmem>>, vector<1x4x256xf32>
    %cst = arith.constant dense<0.000000e+00> : vector<1x4xf32>
    %1 = vector.multi_reduction <add>, %0, %cst [2] : vector<1x4x256xf32> to vector<1x4xf32>
    %2 = vector.shape_cast %1 : vector<1x4xf32> to vector<1x4x1xf32>
    %cst_2 = arith.constant 2.560000e+02 : f32
    %3 = vector.broadcast %cst_2 : f32 to vector<1x4x1xf32>
    %4 = arith.divf %2, %3 : vector<1x4x1xf32>
    %5 = vector.broadcast %4 : vector<1x4x1xf32> to vector<1x4x256xf32>
    %6 = arith.subf %0, %5 : vector<1x4x256xf32>
    %7 = arith.mulf %6, %6 : vector<1x4x256xf32>
    %cst_3 = arith.constant dense<0.000000e+00> : vector<1x4xf32>
    %8 = vector.multi_reduction <add>, %7, %cst_3 [2] : vector<1x4x256xf32> to vector<1x4xf32>
    %9 = vector.shape_cast %8 : vector<1x4xf32> to vector<1x4x1xf32>
    %cst_4 = arith.constant 2.560000e+02 : f32
    %10 = vector.broadcast %cst_4 : f32 to vector<1x4x1xf32>
    %11 = arith.divf %9, %10 : vector<1x4x1xf32>
    %cst_5 = arith.constant 9.99999974E-6 : f32
    %12 = vector.broadcast %cst_5 : f32 to vector<1x4x1xf32>
    %13 = arith.addf %11, %12 : vector<1x4x1xf32>
    %14 = math.rsqrt %13 : vector<1x4x1xf32>
    %c0_6 = arith.constant 0 : index
    %c0_7 = arith.constant 0 : index
    %c0_8 = arith.constant 0 : index
    %15 = vector.load %arg3[%c0_6, %c0_7, %c0_8] : memref<1x4x2xf32, #tpu.memory_space<vmem>>, vector<1x4x2xf32>
    %16 = vector.extract_strided_slice %15 {offsets = [0, 0, 0], sizes = [1, 4, 1], strides = [1, 1, 1]} : vector<1x4x2xf32> to vector<1x4x1xf32>
    %17 = arith.mulf %16, %14 : vector<1x4x1xf32>
    %18 = vector.extract_strided_slice %15 {offsets = [0, 0, 1], sizes = [1, 4, 1], strides = [1, 1, 1]} : vector<1x4x2xf32> to vector<1x4x1xf32>
    %19 = vector.broadcast %17 : vector<1x4x1xf32> to vector<1x4x256xf32>
    %20 = arith.mulf %6, %19 : vector<1x4x256xf32>
    %21 = vector.broadcast %18 : vector<1x4x1xf32> to vector<1x4x256xf32>
    %22 = arith.addf %20, %21 : vector<1x4x256xf32>
    %c0_9 = arith.constant 0 : index
    %c0_10 = arith.constant 0 : index
    %c0_11 = arith.constant 0 : index
    %23 = vector.load %arg4[%c0_9, %c0_10, %c0_11] : memref<1x4x256xf32, #tpu.memory_space<vmem>>, vector<1x4x256xf32>
    tpu.vector_store %arg4[%c0_9, %c0_10, %c0_11], %22 {strides = array<i32>} : memref<1x4x256xf32, #tpu.memory_space<vmem>>, vector<1x4x256xf32>,
    return
  }
  func.func @transform_0(%arg0: i32, %arg1: i32) -> (i32, i32, i32) {
    %c0_i32 = arith.constant 0 : i32
    %c0_i32_0 = arith.constant 0 : i32
    return %arg0, %arg1, %c0_i32 : i32, i32, i32
  }
  func.func @transform_1(%arg0: i32, %arg1: i32) -> (i32, i32, i32) {
    %c0_i32 = arith.constant 0 : i32
    %c0_i32_0 = arith.constant 0 : i32
    return %arg0, %arg1, %c0_i32 : i32, i32, i32
  }
  func.func @transform_2(%arg0: i32, %arg1: i32) -> (i32, i32, i32) {
    %c0_i32 = arith.constant 0 : i32
    %c0_i32_0 = arith.constant 0 : i32
    return %arg0, %arg1, %c0_i32 : i32, i32, i32
  }
}

</mosaic_0001>

<bundles_post_ra>
// kernel: tpu_custom_call.1
= control target key start
LH: loop header
LB: loop body
LE: loop exit
PB: predicated region body
PF: predicated region fallthrough
CT: control target
= control target key end

     0   :  { %7 = vsyncpa [#allocation3], 0  ;;  %s793_s0 = inlined_call_operand.hbm [shape: f32[2,4,256], index: 0, kind: input, shape index: {}]   ;;  %s794_s1 = inlined_call_operand.vmem [shape: f32[2,4,2], index: 1, kind: input, shape index: {}]   ;;  %s795_s2 = inlined_call_operand.hbm [shape: f32[2,4,256], index: 2, kind: output, shape index: {}]  }
   0x1   :  { %9 = vsyncpa [#allocation3 + $0x1], 0 }
   0x2   :  { %10 = vsyncpa [#allocation4], 0 }
   0x3   :  { %12 = vsyncpa [#allocation4 + $0x1], 0  ;;  %s608_s9 = smov 0   ;;  %s610_s10 = smov 0  }
   0x4   :  { %s612_s11 = smov 0   ;;  %s614_s12 = smov 0  }
   0x5   :  { %s616_s13 = smov 0   ;;  %s618_s14 = smov 0  }
   0x6 LB: > { %s385_s15 = sadd.s32 4294967295, %s586_s14   ;;  %s386_s16 = sadd.s32 4294967294, %s586_s14   ;;  %s586_s14 = sphi %s618_s14, %s18_s14   ;;  %s582_s13 = sphi %s616_s13, %s811_s13   ;;  %s578_s12 = sphi %s614_s12, %s810_s12   ;;  %s574_s11 = sphi %s612_s11, %s809_s11   ;;  %s570_s10 = sphi %s610_s10, %s808_s10   ;;  %s566_s9 = sphi %s608_s9, %s807_s9  }
   0x7   : > { %s30_s17 = sadd.s32 1, %s582_s13  ;;  %s39_s18 = sadd.s32 1, %s574_s11 }
   0x8   : > { %p32_p0 = scmp.ge.s32.totalorder %s30_s17, 2  ;;  %p46_p1 = scmp.ne.s32.totalorder %s574_s11, %s570_s10 }
   0x9   : > { %p47_p2 = scmp.eq.s32.totalorder %s586_s14, 0  ;;  %p52_p3 = scmp.ne.s32.totalorder %s570_s10, %s566_s9 }
   0xa   : > { %s813_s17 = smov (%p32_p0, %s30_s17), 0  ;;  %p53_p5 = scmp.eq.s32.totalorder %s385_s15, 0 }
   0xb   : > { %p649_p4 = por %p47_p2, %p46_p1  ;;  %s34_s20 = ssub.s32 %s582_s13, %s813_s17 }
   0xc   : > { %p106_p6 = scmp.eq.s32.totalorder %s385_s15, 1  ;;  %p37_p7 = scmp.eq.s32.totalorder %s34_s20, 0 }
   0xd   : > { %p655_p8 = por %p53_p5, %p52_p3  ;;  %p112_p10 = scmp.eq.s32.totalorder %s386_s16, 1 }
   0xe   : > { %p659_p9 = por %p106_p6, %p46_p1  ;;  %p415_p13 = scmp.lt.s32.totalorder %s586_s14, 2 }
   0xf   : > { %s664_s23 = scalar_select %p37_p7, %s574_s11, %s39_s18  }
  0x10   : > { %s799_s22 = scalar_select %p659_p9, 1, 0 }
  0x11   : > { %p666_p11 = por %p112_p10, %p52_p3  ;;  %s132_s25 = sand.u32 1, %s574_s11  }
  0x12   : > { %s389_s26 = sshll.u32 %s132_s25, 3  ;;  %s401_s27 = sshll.u32 %s582_s13, 7 }
  0x13   : > { %s800_s24 = scalar_select %p666_p11, 1, 0 }
  0x14   : > { %s677_s30 = scalar_lea.hbm %s793_s0, %s401_s27  ;;  %s136_s3 = scalar_lea.vmem [#allocation2], %s389_s26 }
  0x15   : > { %s146_s4 = sshll.u32 %s136_s3, 4  ;;  %p683_p0 = pnand %p415_p13, %p649_p4  ;;  %s679_s4 = int_to_ptr.vmem [resolvable:$true] %s146_s4 }
  0x16   : > { %s133_s6 = scalar_lea.sflag [#allocation3], %s132_s25  ;;  %s474_s7 = scalar_lea.hbm %s677_s30, 128 }
  0x17   : > { %p475_p3 = scmp.ne.s32.totalorder %s677_s30, %s474_s7  ;;  %p476_p5 = pneg %p683_p0 }
  0x18   : > { %s479_s16 = scalar_lea.hbm %s793_s0, 256  ;;  %p480_p4 = scmp.lt.u32.totalorder %s677_s30, %s793_s0 }
  0x19   : > { %p477_p6 = pnand %p476_p5, %p475_p3  ;;  %p481_p10 = scmp.lt.u32.totalorder %s479_s16, %s474_s7 }
  0x1a   : > { %p483_p12 = scmp.lt.u32.totalorder %s474_s7, %s677_s30 }
  0x1b   : > { %p478_p7 = pneg %p477_p6  ;;  %p482_p13 = por %p481_p10, %p480_p4 }
  0x1d   : > { %p484_p1 = por %p483_p12, %p482_p13 }
  0x1f   : > { %p485_p2 = pnand %p484_p1, %p478_p7 }
  0x21   : > { %488 = shalt.err (!%p485_p2)
}
  0x22   : > { %s489_s20 = scalar_lea.vmem %s679_s4, 128  ;;  %s588_s25 = smov [#allocation2]  }
  0x23   : > { %p490_p3 = scmp.ne.s32.totalorder %s679_s4, %s489_s20  ;;  %s494_s26 = sshll.u32 %s588_s25, 4  ;;  %s495_s26 = int_to_ptr.vmem [resolvable:$false] %s494_s26 }
  0x24   : > { %s496_s27 = scalar_lea.vmem %s495_s26, 256  ;;  %p497_p9 = scmp.lt.s32.totalorder %s679_s4, %s495_s26 }
  0x25   : > { %p492_p6 = pnand %p490_p3, %p476_p5  ;;  %p498_p4 = scmp.lt.s32.totalorder %s496_s27, %s489_s20 }
  0x27   : > { %p493_p11 = pneg %p492_p6  ;;  %p499_p10 = por %p498_p4, %p497_p9 }
  0x29   : > { %p500_p12 = pnand %p499_p10, %p493_p11 }
  0x2b   : > { %503 = shalt.err (!%p500_p12)
}
  0x2c   : > { %410 = dma.hbm_to_vmem [thread:$0]  (!%p683_p0), %s677_s30, 128, %s679_s4, %s133_s6  }
  0x2d   : > { %p802_p1 = scmp.lt.s32.totalorder %s586_s14, 3  ;;  %p803_p2 = scmp.ge.s32.totalorder %s586_s14, 1 }
  0x2f   : > { %p162_p5 = pnand %p803_p2, %p802_p1 }
  0x30   : > { %s719_s28 = sand.u32 (!%p162_p5), 1, %s570_s10  }
  0x31   : > { %165 = sbr.rel (%p162_p5) target bundleno = 528 (0x210), region = 28  ;;  %s393_s29 = sshll.u32 (!%p162_p5), %s719_s28, 3 }
  0x32   : > { %s168_s3 = scalar_lea.sflag (!%p162_p5), [#allocation3], %s719_s28  ;;  %s171_s5 = scalar_lea.vmem (!%p162_p5), [#allocation2], %s393_s29 }
  0x38   : > { %557 = dma.done.wait (%p655_p8), %s168_s3, 128  }
  0x39   : > { %559 = vsyncadd (%p655_p8), %s168_s3, 4294967168  ;;  %vm210_vm0 = vcmask 1043456   ;;  %v206_v0 = vld [vmem:[%s171_s5] sm:$0xff]  ;;  %v589_v5 = vmov 839922192   ;;  %v222_v7 = vlaneseq  ;;  %v590_v20 = vmov 0  }
  0x3a   : > { %v208_v1 = vcombine.high %v206_v0, %v206_v0  ;;  %v211_v2 = vsel %vm210_vm0, %v206_v0, 0.0  ;;  %v220_v6 = vunpack.c.l.s4 %v589_v5  ;;  %468 = vset.pattern.permute.xlu1 %v590_v20  ;;  %v591_v21 = vmov 1   ;;  %p199_p8 = scmp.lt.s32.totalorder %s578_s12, 1  ;;  %s402_s8 = sshll.u32 %s578_s12, 7 }
  0x3b   : > { %v223_v9 = vshrl.u32 %v222_v7, 7  ;;  %470 = vset.pattern.permute.xlu0 %v591_v21  ;;  %s198_s15 = scalar_lea.vmem [#allocation5], %s393_s29  ;;  %s744_s20 = scalar_lea.hbm %s795_s2, %s402_s8 }
  0x3c   : > { %v212_v3 = vsel %vm210_vm0, %v208_v1, 0.0  ;;  %v221_v8 = vunpack.c.0.s8 %v220_v6  ;;  %s200_s21 = scalar_select %p199_p8, %s578_s12, 1 }
  0x3d   : > { %v213_v4 = vadd.f32 %v212_v3, %v211_v2  ;;  %s286_s16 = sshll.u32 %s198_s15, 4  ;;  %s270_s25 = scalar_lea.sflag [#allocation4], %s719_s28  ;;  %s746_s16 = int_to_ptr.vmem [resolvable:$true] %s286_s16 }
  0x3e   : > { %v224_v10 = vsub.s32 %v221_v8, %v223_v9  ;;  %s395_s30 = sshll.u32 %s200_s21, 2  ;;  %s504_s26 = scalar_lea.vmem %s746_s16, 128 }
  0x3f   : > { %214 = vadd.xlane.f32.xlu0 %v213_v4  ;;  %s205_s7 = scalar_lea.vmem %s794_s1, %s395_s30  ;;  %p505_p9 = scmp.ne.s32.totalorder %s746_s16, %s504_s26 }
  0x40   : > { %v240_v25 = vld [vmem:[%s205_s7] sm:$0xf]  ;;  %p804_p11 = scmp.ne.s32.totalorder %s799_s22, 0  ;;  %s592_s12 = smov [#allocation5]  }
  0x41   : > { %s508_s27 = sshll.u32 %s592_s12, 4  ;;  %s509_s27 = int_to_ptr.vmem [resolvable:$false] %s508_s27 }
  0x42   : > { %p506_p0 = pnand %p505_p9, %p804_p11  ;;  %s510_s29 = scalar_lea.vmem %s509_s27, 256 }
  0x43   : > { %p511_p13 = scmp.lt.s32.totalorder %s746_s16, %s509_s27  ;;  %p512_p3 = scmp.lt.s32.totalorder %s510_s29, %s504_s26 }
  0x44   : > { %p507_p7 = pneg %p506_p0 }
  0x45   : > { %p513_p6 = por %p512_p3, %p511_p13 }
  0x47   : > { %p514_p4 = pnand %p513_p6, %p507_p7 }
  0xcc   : > { %v215_v11 = vpop.xlane.xlu0 %214 }
  0xcd   : > { %v217_v12 = vmul.f32 0.00390625, %v215_v11 }
  0xcf   : > { %v225_v13 = vrot.slane %v217_v12, %v224_v10 }
  0xd1   : > { %v227_v14 = vsub.f32 %v206_v0, %v225_v13 }
  0xd3   : > { %v228_v15 = vmul.f32 %v227_v14, %v227_v14 }
  0xd5   : > { %v230_v16 = vcombine.high %v228_v15, %v228_v15  ;;  %v232_v17 = vsel %vm210_vm0, %v228_v15, 0.0 }
  0xd7   : > { %v233_v18 = vsel %vm210_vm0, %v230_v16, 0.0 }
  0xd8   : > { %v234_v19 = vadd.f32 %v233_v18, %v232_v17 }
  0xda   : > { %235 = vadd.xlane.f32.xlu0 %v234_v19 }
 0x167   : > { %v236_v22 = vpop.xlane.xlu0 %235 }
 0x168   : > { %v237_v23 = vmul.f32 0.00390625, %v236_v22 }
 0x16a   : > { %v238_v24 = vadd.f32 1e-05, %v237_v23 }
 0x16c   : > { %472 = vrsqrt.f32 %v238_v24 }
 0x176   : > { %v473_v26 = vpop.eup %472 }
 0x177   : > { %v241_v27 = vmul.f32 %v473_v26, %v240_v25 }
 0x179   : > { %244 = vperm.xlu1 %468, %v241_v27  }
 0x17d   : > { %469 = vset.pattern.permute.xlu1 %v591_v21 }
 0x17e   : > { %257 = vperm.xlu1 %469, %v240_v25  }
 0x1f8   : > { %v245_v28 = vpop.permute.xlu1 %244 }
 0x1f9   : > { %v252_v29 = vrot.slane %v245_v28, %v224_v10 }
 0x1fb   : > { %v254_v31 = vmul.f32 %v252_v29, %v227_v14 }
 0x1fd   : > { %v258_v30 = vpop.permute.xlu1 %257 }
 0x1fe   : > { %v265_v32 = vrot.slane %v258_v30, %v224_v10 }
 0x200   : > { %v267_v33 = vadd.f32 %v265_v32, %v254_v31 }
 0x202   : > { %268 = vst [vmem:[%s198_s15] sm:$0xff] %v267_v33 }
 0x203   : > { %517 = shalt.err (!%p514_p4)
}
 0x204   : > { %s518_s28 = scalar_lea.hbm %s744_s20, 128  ;;  %s522_s21 = scalar_lea.hbm %s795_s2, 256 }
 0x205   : > { %p519_p10 = scmp.ne.s32.totalorder %s744_s20, %s518_s28  ;;  %p523_p2 = scmp.lt.u32.totalorder %s744_s20, %s795_s2 }
 0x206   : > { %p524_p5 = scmp.lt.u32.totalorder %s522_s21, %s518_s28  ;;  %p526_p9 = scmp.lt.u32.totalorder %s518_s28, %s744_s20 }
 0x207   : > { %p520_p12 = pnand %p519_p10, %p804_p11 }
 0x208   : > { %p525_p8 = por %p524_p5, %p523_p2 }
 0x209   : > { %p521_p1 = pneg %p520_p12 }
 0x20a   : > { %p527_p0 = por %p526_p9, %p525_p8 }
 0x20c   : > { %p528_p7 = pnand %p527_p0, %p521_p1 }
 0x20e   : > { %531 = shalt.err (!%p528_p7)
}
 0x20f   : > { %405 = dma.vmem_to_hbm [thread:$0]  (%p804_p11), %s746_s16, 128, %s744_s20, %s270_s25  }
 0x210 PF: > { %s298_s6 = sand.u32 1, %s566_s9   ;;  %p805_p13 = scmp.ne.s32.totalorder %s800_s24, 0 }
 0x211   : > { %p806_p3 = scmp.ge.s32.totalorder %s586_s14, 2  ;;  %s299_s7 = scalar_lea.sflag [#allocation4], %s298_s6 }
 0x213   : > { %p412_p6 = pnand %p806_p3, %p805_p13 }
 0x215   : > { %561 = dma.done.wait (!%p412_p6), %s299_s7, 128  }
 0x216   : > { %563 = vsyncadd (!%p412_p6), %s299_s7, 4294967168  ;;  %s18_s14 = sadd.s32 1, %s586_s14   ;;  %s807_s9 = smov %s570_s10 }
 0x217   : > { %p15_p4 = scmp.ge.s32.totalorder %s18_s14, 4   ;;  %s808_s10 = smov %s574_s11 }
 0x218   : > { %s809_s11 = smov %s664_s23  ;;  %s810_s12 = smov %s582_s13 }
 0x219   : > { %s811_s13 = smov %s813_s17  ;;  %17 = sbr.rel (!%p15_p4) target bundleno = 6 (0x6), region = 76 }
 0x220   :  { %304 = vsyncpa [#allocation3], 1 }
 0x221   :  { %306 = vsyncpa [#allocation3 + $0x1], 1 }
 0x222   :  { %307 = vsyncpa [#allocation4], 1 }
 0x223   :  { %309 = vsyncpa [#allocation4 + $0x1], 1 }

</bundles_post_ra>
